<compile_context>
chip_gen: v6e
topology: v6e:2x2x1
jax: 0.10.0
libtpu: 0.0.40
codegen_flags: <defaults>
</compile_context>

<pallas_src>
import functools

import jax
import jax.numpy as jnp
from jax.experimental import pallas as pl
from jax.experimental.pallas import tpu as pltpu


def _cotuning_kernel(x_ref, t_ref, o_ref, m_ref, l_ref, ts_ref, tx_ref,
                     *, n_p, tn, mask_cols):
    """Online-logsumexp accumulation over class tiles.

    For every batch tile i, class tiles j = 0..nj-1 are visited in order
    (class axis is the innermost, "arbitrary", grid axis).  Running per-row
    accumulators live in VMEM scratch:
        m  : running max of logits
        l  : running sum of exp(x - m)
        ts : running sum of t
        tx : running sum of t * x
    On the last class tile the per-row loss
        loss[r] = sum(t[r]) * logsumexp(x[r]) - sum(t[r] * x[r])
    is written.  Rows are independent, so garbage in remainder-tile padding
    rows stays in padding rows and is clipped at output writeback.
    """
    j = pl.program_id(1)
    nj = pl.num_programs(1)

    @pl.when(j == 0)
    def _init():
        m_ref[...] = jnp.full_like(m_ref, -jnp.inf)
        l_ref[...] = jnp.zeros_like(l_ref)
        ts_ref[...] = jnp.zeros_like(ts_ref)
        tx_ref[...] = jnp.zeros_like(tx_ref)

    x = x_ref[...].astype(jnp.float32)
    t = t_ref[...].astype(jnp.float32)

    if mask_cols:
        # Remainder class tile: mask out-of-range columns so padding garbage
        # cannot corrupt the reductions of valid rows.
        col = jax.lax.broadcasted_iota(jnp.int32, x.shape, 1) + j * tn
        valid = col < n_p
        x = jnp.where(valid, x, jnp.float32(-1e30))
        t = jnp.where(valid, t, jnp.float32(0.0))

    # Online (streaming) logsumexp update.
    m_prev = m_ref[...]
    m_new = jnp.maximum(m_prev, jnp.max(x, axis=-1, keepdims=True))
    alpha = jnp.exp(m_prev - m_new)          # exp(-inf) == 0 on the first tile
    l_ref[...] = alpha * l_ref[...] + jnp.sum(jnp.exp(x - m_new),
                                              axis=-1, keepdims=True)
    m_ref[...] = m_new

    ts_ref[...] = ts_ref[...] + jnp.sum(t, axis=-1, keepdims=True)
    tx_ref[...] = tx_ref[...] + jnp.sum(t * x, axis=-1, keepdims=True)

    @pl.when(j == nj - 1)
    def _finalize():
        lse = m_ref[...] + jnp.log(l_ref[...])
        o_ref[...] = ts_ref[...] * lse - tx_ref[...]      # (tb, 1) f32


def _round_up(n: int, m: int) -> int:
    return ((n + m - 1) // m) * m


def _choose_tiles(b: int, n_p: int, itemsize: int):
    """Generation-aware tile sizing.

    Returns (batch_tile, class_tile, vmem_limit_bytes).
    """
    try:
        info = pltpu.get_tpu_info()
        vmem_cap = int(getattr(info, "vmem_capacity_bytes", 0)) or (64 << 20)
    except Exception:                           # no TPU info available
        vmem_cap = 64 << 20                     # conservative (v7x per-TC)
    # Explicit scoped-VMEM limit (passed to CompilerParams): ~3/4 of physical,
    # capped well under every generation's capacity.
    vmem_limit = int(min((vmem_cap * 3) // 4, 96 << 20))
    budget = (vmem_limit * 4) // 5              # 20% headroom for compiler use

    def per_row_bytes(tn):
        # 2 inputs x 2 pipeline buffers in the input dtype
        # + ~4 live f32 temporaries (x, t, exp(x-m), t*x) per class tile.
        return 4 * tn * itemsize + 4 * tn * 4

    # Prefer keeping the whole class axis in a single tile.
    tn = n_p
    tb_budget = (budget // per_row_bytes(tn)) // 8 * 8
    target_tb = min(256, _round_up(b, 8))
    if tb_budget < target_tb:
        # VMEM would force tiny batch tiles -> tile the class axis instead
        # (online logsumexp keeps it exact) so the batch tile stays large.
        tn = (budget // (target_tb * per_row_bytes(1))) // 128 * 128
        tn = max(128, min(tn, _round_up(n_p, 128)))
        if tn >= n_p:
            tn = n_p
        tb_budget = max(8, (budget // per_row_bytes(tn)) // 8 * 8)

    # Measured roofline plateaus around 512-row tiles; keep >= ~8 grid steps
    # so double-buffering overlaps and v7x's two TensorCores both get work,
    # but never drop below 256 rows when the budget / batch allow it.
    tb_cap = min(tb_budget, 512)
    tb_steps = _round_up(pl.cdiv(b, 8), 8)
    tb = max(min(tb_cap, tb_steps), min(256, tb_cap), 8)
    if tb >= b:
        tb = b                                  # single tile: full (unpadded) dim
    return int(tb), int(tn), vmem_limit


def cotuning_loss(inputs: jax.Array, targets: jax.Array,
                  regularization_weight: float = 0.01,
                  *, batch_tile: int | None = None,
                  class_tile: int | None = None) -> jax.Array:
    """Pallas TPU implementation of CoTuningLoss.forward.

    inputs:  (b, N_p) source-classifier logits p(y_s)   (f32 or bf16)
    targets: (b, N_p) soft targets p(y_s | y_t)         (f32 or bf16)
    returns: scalar float32 loss

    Caller contract: this kernel is HBM-bandwidth bound; pass bf16 inputs
    directly when available (no cast is performed in this wrapper).
    """
    assert inputs.ndim == 2 and inputs.shape == targets.shape
    b, n_p = inputs.shape
    itemsize = max(jnp.dtype(inputs.dtype).itemsize,
                   jnp.dtype(targets.dtype).itemsize)

    tb, tn, vmem_limit = _choose_tiles(b, n_p, itemsize)
    if batch_tile is not None:
        tb = int(batch_tile)
    if class_tile is not None:
        tn = int(class_tile)
    tb = min(tb, b)
    tn = min(tn, n_p)
    mask_cols = (n_p % tn) != 0

    grid = (pl.cdiv(b, tb), pl.cdiv(n_p, tn))

    cost = pl.CostEstimate(
        flops=6 * b * n_p,
        transcendentals=b * n_p,
        bytes_accessed=b * n_p * (jnp.dtype(inputs.dtype).itemsize
                                  + jnp.dtype(targets.dtype).itemsize) + b * 4,
    )

    kernel = functools.partial(_cotuning_kernel, n_p=n_p, tn=tn,
                               mask_cols=mask_cols)

    per_row = pl.pallas_call(
        kernel,
        out_shape=jax.ShapeDtypeStruct((b, 1), jnp.float32),
        grid_spec=pltpu.PrefetchScalarGridSpec(
            num_scalar_prefetch=0,
            grid=grid,
            in_specs=[
                pl.BlockSpec((tb, tn), lambda i, j: (i, j)),
                pl.BlockSpec((tb, tn), lambda i, j: (i, j)),
            ],
            out_specs=pl.BlockSpec((tb, 1), lambda i, j: (i, 0)),
            scratch_shapes=[
                pltpu.VMEM((tb, 1), jnp.float32),   # running max m
                pltpu.VMEM((tb, 1), jnp.float32),   # running sum exp(x-m)
                pltpu.VMEM((tb, 1), jnp.float32),   # running sum t
                pltpu.VMEM((tb, 1), jnp.float32),   # running sum t*x
            ],
        ),
        compiler_params=pltpu.CompilerParams(
            dimension_semantics=("parallel", "arbitrary"),
            vmem_limit_bytes=vmem_limit),
        cost_estimate=cost,
    )(inputs, targets)

    # Mean over the true batch size, scaled once by the regularization weight.
    scale = jnp.float32(regularization_weight) / jnp.float32(b)
    return scale * jnp.sum(per_row)


def _reference(inputs, targets, regularization_weight=0.01):
    logsm = jax.nn.log_softmax(inputs.astype(jnp.float32), axis=-1)
    y = jnp.sum(-targets.astype(jnp.float32) * logsm, axis=-1)
    return jnp.float32(regularization_weight) * jnp.mean(y)


if __name__ == "__main__":
    key = jax.random.PRNGKey(0)
    k1, k2, k3, k4, k5, k6 = jax.random.split(key, 6)

    # Case 1: small single-tile problem (b, N_p) = (8, 64), auto tiling.
    b, n_p = 8, 64
    logits = jax.random.normal(k1, (b, n_p), dtype=jnp.float32)
    targets = jax.nn.softmax(jax.random.normal(k2, (b, n_p),
                                               dtype=jnp.float32), axis=-1)
    loss = cotuning_loss(logits, targets, regularization_weight=0.01)
    jax.block_until_ready(loss)
    ref = _reference(logits, targets, regularization_weight=0.01)
    assert jnp.allclose(loss, ref, rtol=1e-5, atol=1e-6), (loss, ref)

    # Case 2: multi-tile batch grid with a remainder tile (b=20, tb=8).
    b2, n_p2 = 20, 64
    logits2 = jax.random.normal(k3, (b2, n_p2), dtype=jnp.float32)
    targets2 = jax.nn.softmax(jax.random.normal(k4, (b2, n_p2),
                                                dtype=jnp.float32), axis=-1)
    loss2 = cotuning_loss(logits2, targets2, regularization_weight=0.01,
                          batch_tile=8)
    jax.block_until_ready(loss2)
    ref2 = _reference(logits2, targets2, regularization_weight=0.01)
    assert jnp.allclose(loss2, ref2, rtol=1e-5, atol=1e-6), (loss2, ref2)

    # Case 3: class-axis tiling path (online logsumexp + column mask) with
    # bf16 inputs: (b=24, N_p=320), tb=8, tn=128 (remainder class tile of 64).
    b3, n_p3 = 24, 320
    logits3 = jax.random.normal(k5, (b3, n_p3),
                                dtype=jnp.float32).astype(jnp.bfloat16)
    targets3 = jax.nn.softmax(jax.random.normal(k6, (b3, n_p3),
                                                dtype=jnp.float32),
                              axis=-1).astype(jnp.bfloat16)
    loss3 = cotuning_loss(logits3, targets3, regularization_weight=0.01,
                          batch_tile=8, class_tile=128)
    jax.block_until_ready(loss3)
    ref3 = _reference(logits3, targets3, regularization_weight=0.01)
    assert jnp.allclose(loss3, ref3, rtol=1e-3, atol=1e-5), (loss3, ref3)

    print("KERNEL_OK")
</pallas_src>

<mosaic_0001>
module attributes {stable_mosaic.version = 11 : i64} {
  func.func @_cotuning_kernel(%arg0: i32, %arg1: i32, %arg2: memref<8x64xf32, #tpu.memory_space<vmem>>, %arg3: memref<8x64xf32, #tpu.memory_space<vmem>>, %arg4: memref<8x1xf32, #tpu.memory_space<vmem>>, %arg5: memref<8x1xf32, #tpu.memory_space<vmem>>, %arg6: memref<8x1xf32, #tpu.memory_space<vmem>>, %arg7: memref<8x1xf32, #tpu.memory_space<vmem>>, %arg8: memref<8x1xf32, #tpu.memory_space<vmem>>) attributes {dimension_semantics = [#tpu.dimension_semantics<parallel>, #tpu.dimension_semantics<arbitrary>], iteration_bounds = array<i64: 1, 1>, scalar_prefetch = 0 : i64, scratch_operands = 4 : i64, tpu.core_type = #tpu.core_type<tc>, window_params = [{transform_indices = @transform_0, window_bounds = array<i64: 8, 64>}, {transform_indices = @transform_1, window_bounds = array<i64: 8, 64>}, {transform_indices = @transform_2, window_bounds = array<i64: 8, 1>}]} {
    %c0_i32 = arith.constant 0 : i32
    %0 = arith.cmpi eq, %arg1, %c0_i32 : i32
    %1 = arith.extui %0 : i1 to i32
    %c0_i32_0 = arith.constant 0 : i32
    %2 = arith.cmpi ne, %1, %c0_i32_0 : i32
    scf.if %2 {
      %cst_25 = arith.constant 0xFF800000 : f32
      %35 = vector.broadcast %cst_25 : f32 to vector<8x1xf32>
      %c0_26 = arith.constant 0 : index
      %c0_27 = arith.constant 0 : index
      %36 = vector.load %arg5[%c0_26, %c0_27] : memref<8x1xf32, #tpu.memory_space<vmem>>, vector<8x1xf32>
      tpu.vector_store %arg5[%c0_26, %c0_27], %35 {strides = array<i32>} : memref<8x1xf32, #tpu.memory_space<vmem>>, vector<8x1xf32>,
      %cst_28 = arith.constant 0.000000e+00 : f32
      %37 = vector.broadcast %cst_28 : f32 to vector<8x1xf32>
      %c0_29 = arith.constant 0 : index
      %c0_30 = arith.constant 0 : index
      %38 = vector.load %arg6[%c0_29, %c0_30] : memref<8x1xf32, #tpu.memory_space<vmem>>, vector<8x1xf32>
      tpu.vector_store %arg6[%c0_29, %c0_30], %37 {strides = array<i32>} : memref<8x1xf32, #tpu.memory_space<vmem>>, vector<8x1xf32>,
      %cst_31 = arith.constant 0.000000e+00 : f32
      %39 = vector.broadcast %cst_31 : f32 to vector<8x1xf32>
      %c0_32 = arith.constant 0 : index
      %c0_33 = arith.constant 0 : index
      %40 = vector.load %arg7[%c0_32, %c0_33] : memref<8x1xf32, #tpu.memory_space<vmem>>, vector<8x1xf32>
      tpu.vector_store %arg7[%c0_32, %c0_33], %39 {strides = array<i32>} : memref<8x1xf32, #tpu.memory_space<vmem>>, vector<8x1xf32>,
      %cst_34 = arith.constant 0.000000e+00 : f32
      %41 = vector.broadcast %cst_34 : f32 to vector<8x1xf32>
      %c0_35 = arith.constant 0 : index
      %c0_36 = arith.constant 0 : index
      %42 = vector.load %arg8[%c0_35, %c0_36] : memref<8x1xf32, #tpu.memory_space<vmem>>, vector<8x1xf32>
      tpu.vector_store %arg8[%c0_35, %c0_36], %41 {strides = array<i32>} : memref<8x1xf32, #tpu.memory_space<vmem>>, vector<8x1xf32>,
    } else {
    }
    %c0 = arith.constant 0 : index
    %c0_1 = arith.constant 0 : index
    %3 = vector.load %arg2[%c0, %c0_1] : memref<8x64xf32, #tpu.memory_space<vmem>>, vector<8x64xf32>
    %c0_2 = arith.constant 0 : index
    %c0_3 = arith.constant 0 : index
    %4 = vector.load %arg3[%c0_2, %c0_3] : memref<8x64xf32, #tpu.memory_space<vmem>>, vector<8x64xf32>
    %c0_4 = arith.constant 0 : index
    %c0_5 = arith.constant 0 : index
    %5 = vector.load %arg5[%c0_4, %c0_5] : memref<8x1xf32, #tpu.memory_space<vmem>>, vector<8x1xf32>
    %cst = arith.constant dense<0xFF800000> : vector<8xf32>
    %6 = vector.multi_reduction <maximumf>, %3, %cst [1] : vector<8x64xf32> to vector<8xf32>
    %7 = vector.shape_cast %6 : vector<8xf32> to vector<8x1xf32>
    %8 = arith.maximumf %5, %7 : vector<8x1xf32>
    %9 = arith.subf %5, %8 : vector<8x1xf32>
    %10 = math.exp %9 : vector<8x1xf32>
    %c0_6 = arith.constant 0 : index
    %c0_7 = arith.constant 0 : index
    %11 = vector.load %arg6[%c0_6, %c0_7] : memref<8x1xf32, #tpu.memory_space<vmem>>, vector<8x1xf32>
    %12 = arith.mulf %10, %11 : vector<8x1xf32>
    %13 = vector.broadcast %8 : vector<8x1xf32> to vector<8x64xf32>
    %14 = arith.subf %3, %13 : vector<8x64xf32>
    %15 = math.exp %14 : vector<8x64xf32>
    %cst_8 = arith.constant dense<0.000000e+00> : vector<8xf32>
    %16 = vector.multi_reduction <add>, %15, %cst_8 [1] : vector<8x64xf32> to vector<8xf32>
    %17 = vector.shape_cast %16 : vector<8xf32> to vector<8x1xf32>
    %18 = arith.addf %12, %17 : vector<8x1xf32>
    %c0_9 = arith.constant 0 : index
    %c0_10 = arith.constant 0 : index
    %19 = vector.load %arg6[%c0_9, %c0_10] : memref<8x1xf32, #tpu.memory_space<vmem>>, vector<8x1xf32>
    tpu.vector_store %arg6[%c0_9, %c0_10], %18 {strides = array<i32>} : memref<8x1xf32, #tpu.memory_space<vmem>>, vector<8x1xf32>,
    %c0_11 = arith.constant 0 : index
    %c0_12 = arith.constant 0 : index
    %20 = vector.load %arg5[%c0_11, %c0_12] : memref<8x1xf32, #tpu.memory_space<vmem>>, vector<8x1xf32>
    tpu.vector_store %arg5[%c0_11, %c0_12], %8 {strides = array<i32>} : memref<8x1xf32, #tpu.memory_space<vmem>>, vector<8x1xf32>,
    %c0_13 = arith.constant 0 : index
    %c0_14 = arith.constant 0 : index
    %21 = vector.load %arg7[%c0_13, %c0_14] : memref<8x1xf32, #tpu.memory_space<vmem>>, vector<8x1xf32>
    %cst_15 = arith.constant dense<0.000000e+00> : vector<8xf32>
    %22 = vector.multi_reduction <add>, %4, %cst_15 [1] : vector<8x64xf32> to vector<8xf32>
    %23 = vector.shape_cast %22 : vector<8xf32> to vector<8x1xf32>
    %24 = arith.addf %21, %23 : vector<8x1xf32>
    %c0_16 = arith.constant 0 : index
    %c0_17 = arith.constant 0 : index
    %25 = vector.load %arg7[%c0_16, %c0_17] : memref<8x1xf32, #tpu.memory_space<vmem>>, vector<8x1xf32>
    tpu.vector_store %arg7[%c0_16, %c0_17], %24 {strides = array<i32>} : memref<8x1xf32, #tpu.memory_space<vmem>>, vector<8x1xf32>,
    %c0_18 = arith.constant 0 : index
    %c0_19 = arith.constant 0 : index
    %26 = vector.load %arg8[%c0_18, %c0_19] : memref<8x1xf32, #tpu.memory_space<vmem>>, vector<8x1xf32>
    %27 = arith.mulf %4, %3 : vector<8x64xf32>
    %cst_20 = arith.constant dense<0.000000e+00> : vector<8xf32>
    %28 = vector.multi_reduction <add>, %27, %cst_20 [1] : vector<8x64xf32> to vector<8xf32>
    %29 = vector.shape_cast %28 : vector<8xf32> to vector<8x1xf32>
    %30 = arith.addf %26, %29 : vector<8x1xf32>
    %c0_21 = arith.constant 0 : index
    %c0_22 = arith.constant 0 : index
    %31 = vector.load %arg8[%c0_21, %c0_22] : memref<8x1xf32, #tpu.memory_space<vmem>>, vector<8x1xf32>
    tpu.vector_store %arg8[%c0_21, %c0_22], %30 {strides = array<i32>} : memref<8x1xf32, #tpu.memory_space<vmem>>, vector<8x1xf32>,
    %c0_i32_23 = arith.constant 0 : i32
    %32 = arith.cmpi eq, %arg1, %c0_i32_23 : i32
    %33 = arith.extui %32 : i1 to i32
    %c0_i32_24 = arith.constant 0 : i32
    %34 = arith.cmpi ne, %33, %c0_i32_24 : i32
    scf.if %34 {
      %c0_25 = arith.constant 0 : index
      %c0_26 = arith.constant 0 : index
      %35 = vector.load %arg5[%c0_25, %c0_26] : memref<8x1xf32, #tpu.memory_space<vmem>>, vector<8x1xf32>
      %c0_27 = arith.constant 0 : index
      %c0_28 = arith.constant 0 : index
      %36 = vector.load %arg6[%c0_27, %c0_28] : memref<8x1xf32, #tpu.memory_space<vmem>>, vector<8x1xf32>
      %37 = math.log %36 : vector<8x1xf32>
      %38 = arith.addf %35, %37 : vector<8x1xf32>
      %c0_29 = arith.constant 0 : index
      %c0_30 = arith.constant 0 : index
      %39 = vector.load %arg7[%c0_29, %c0_30] : memref<8x1xf32, #tpu.memory_space<vmem>>, vector<8x1xf32>
      %40 = arith.mulf %39, %38 : vector<8x1xf32>
      %c0_31 = arith.constant 0 : index
      %c0_32 = arith.constant 0 : index
      %41 = vector.load %arg8[%c0_31, %c0_32] : memref<8x1xf32, #tpu.memory_space<vmem>>, vector<8x1xf32>
      %42 = arith.subf %40, %41 : vector<8x1xf32>
      %c0_33 = arith.constant 0 : index
      %c0_34 = arith.constant 0 : index
      %43 = vector.load %arg4[%c0_33, %c0_34] : memref<8x1xf32, #tpu.memory_space<vmem>>, vector<8x1xf32>
      tpu.vector_store %arg4[%c0_33, %c0_34], %42 {strides = array<i32>} : memref<8x1xf32, #tpu.memory_space<vmem>>, vector<8x1xf32>,
    } else {
    }
    return
  }
  func.func @transform_0(%arg0: i32, %arg1: i32) -> (i32, i32) {
    %c0_i32 = arith.constant 0 : i32
    return %arg0, %arg1 : i32, i32
  }
  func.func @transform_1(%arg0: i32, %arg1: i32) -> (i32, i32) {
    %c0_i32 = arith.constant 0 : i32
    return %arg0, %arg1 : i32, i32
  }
  func.func @transform_2(%arg0: i32, %arg1: i32) -> (i32, i32) {
    %c0_i32 = arith.constant 0 : i32
    %c0_i32_0 = arith.constant 0 : i32
    return %arg0, %c0_i32 : i32, i32
  }
}

</mosaic_0001>

<bundles_post_ra>
// kernel: tpu_custom_call.1
= control target key start
LH: loop header
LB: loop body
LE: loop exit
PB: predicated region body
PF: predicated region fallthrough
CT: control target
= control target key end

     0   :  { %7 = vsyncpa [#allocation7], 0  ;;  %s202_s0 = inlined_call_operand.hbm [shape: f32[8,64], index: 0, kind: input, shape index: {}]   ;;  %s203_s1 = inlined_call_operand.hbm [shape: f32[8,64], index: 1, kind: input, shape index: {}]   ;;  %s204_s2 = inlined_call_operand.vmem [shape: f32[8,1], index: 2, kind: output, shape index: {}]  }
   0x1   :  { %8 = vsyncpa [#allocation9], 0  ;;  %s160_s9 = smov [#allocation6]   ;;  %s161_s11 = smov [#allocation8]  }
   0x2   :  { %s15_s10 = sshll.u32 %s160_s9, 4  ;;  %s25_s12 = sshll.u32 %s161_s11, 4  ;;  %s16_s10 = int_to_ptr.vmem [resolvable:$true] %s15_s10  ;;  %s26_s12 = int_to_ptr.vmem [resolvable:$true] %s25_s12 }
   0x3   :  { %s124_s13 = scalar_lea.vmem %s16_s10, 128  ;;  %p129_p1 = scmp.lt.s32.totalorder %s16_s10, %s16_s10 }
   0x4   :  { %p125_p0 = scmp.ne.s32.totalorder %s16_s10, %s124_s13  ;;  %p130_p2 = scmp.lt.s32.totalorder %s124_s13, %s124_s13 }
   0x6   :  { %p131_p3 = por %p130_p2, %p129_p1 }
   0x8   :  { %p132_p4 = pnand %p131_p3, %p125_p0 }
   0xa   :  { %135 = shalt.err (!%p132_p4)
}
   0xb   :  { %18 = dma.hbm_to_vmem [thread:$0]  %s202_s0, 128, %s16_s10, [#allocation7]  }
   0xc   :  { %s144_s16 = scalar_lea.vmem %s26_s12, 128  ;;  %p149_p6 = scmp.lt.s32.totalorder %s26_s12, %s26_s12 }
   0xd   :  { %p145_p5 = scmp.ne.s32.totalorder %s26_s12, %s144_s16  ;;  %p150_p7 = scmp.lt.s32.totalorder %s144_s16, %s144_s16 }
   0xf   :  { %p151_p8 = por %p150_p7, %p149_p6 }
  0x11   :  { %p152_p9 = pnand %p151_p8, %p145_p5 }
  0x13   :  { %155 = shalt.err (!%p152_p9)
}
  0x14   :  { %28 = dma.hbm_to_vmem [thread:$0]  %s203_s1, 128, %s26_s12, [#allocation9]  }
  0x15   :  { %156 = dma.done.wait [#allocation7], 128  }
  0x16   :  { %157 = vsyncadd [#allocation7], 4294967168 }
  0x17   :  { %158 = dma.done.wait [#allocation9], 128  }
  0x18   :  { %159 = vsyncadd [#allocation9], 4294967168  ;;  %vm39_vm0 = vcmask 7168   ;;  %v162_v0 = vmov -inf   ;;  %vm47_vm1 = vcmask 523264   ;;  %v44_v1 = vld [vmem:[#allocation6] sm:$0xff] }
  0x19   :  { %40 = vst.msk [vmem:[#allocation2] sm:$0xff] %vm39_vm0, %v162_v0  ;;  %v48_v2 = vsel %vm47_vm1, %v44_v1, -inf  ;;  %v163_v3 = vmov 0   ;;  %v164_v4 = vmov 0.0   ;;  %v45_v13 = vld [vmem:[#allocation8] sm:$0xff] }
  0x1a   :  { %49 = vmax.xlane.f32.xlu0 %v48_v2  ;;  %41 = vst.msk [vmem:[#allocation3] sm:$0xff] %vm39_vm0, %v164_v4  ;;  %42 = vst.msk [vmem:[#allocation4] sm:$0xff] %vm39_vm0, %v164_v4  ;;  %v73_v15 = vsel %vm47_vm1, %v45_v13, 0.0  ;;  %v79_v16 = vmul.f32 %v45_v13, %v44_v1 }
  0x1b   :  { %109 = vset.pattern.permute.xlu0 %v163_v3  ;;  %43 = vst.msk [vmem:[#allocation5] sm:$0xff] %vm39_vm0, %v164_v4 }
  0x1c   :  { %v80_v17 = vsel %vm47_vm1, %v79_v16, 0.0 }
  0x20   :  { %v46_v5 = vld [vmem:[#allocation2] sm:$0xff] }
  0x21   :  { %v55_v20 = vld [vmem:[#allocation3] sm:$0xff]  ;;  %v72_v24 = vld [vmem:[#allocation4] sm:$0xff] }
  0x22   :  { %v78_v27 = vld [vmem:[#allocation5] sm:$0xff] }
  0xa3   :  { %v50_v6 = vpop.xlane.xlu0 %49 }
  0xa4   :  { %v51_v7 = vmax.f32 %v46_v5, %v50_v6 }
  0xa6   :  { %v52_v8 = vsub.f32 %v46_v5, %v51_v7  ;;  %71 = vst.msk [vmem:[#allocation2] sm:$0xff] %vm39_vm0, %v51_v7  ;;  %59 = vperm.xlu0 %109, %v51_v7  }
  0xa8   :  { %v53_v18 = vmul.f32 1.442695, %v52_v8 }
  0xad   :  { %v88_v33 = vld [vmem:[#allocation2] sm:$0xff] }
 0x121   :  { %v60_v9 = vpop.permute.xlu0 %59 }
 0x122   :  { %v62_v10 = vsub.f32 %v44_v1, %v60_v9 }
 0x124   :  { %v63_v11 = vmul.f32 1.442695, %v62_v10 }
 0x126   :  { %110 = vpow2.f32 %v63_v11 }
 0x127   :  { %112 = vpow2.f32 %v53_v18 }
 0x133   :  { %v111_v12 = vpop.eup %110 }
 0x134   :  { %v65_v14 = vsel %vm47_vm1, %v111_v12, 0.0  ;;  %v113_v19 = vpop.eup %112 }
 0x135   :  { %66 = vadd.xlane.f32.xlu1 %v65_v14  ;;  %v56_v21 = vmul.f32 %v113_v19, %v55_v20 }
 0x139   :  { %74 = vadd.xlane.f32.xlu1 %v73_v15 }
 0x13d   :  { %81 = vadd.xlane.f32.xlu1 %v80_v17 }
 0x1be   :  { %v67_v22 = vpop.xlane.xlu1 %66 }
 0x1bf   :  { %v68_v23 = vadd.f32 %v67_v22, %v56_v21 }
 0x1c1   :  { %70 = vst.msk [vmem:[#allocation3] sm:$0xff] %vm39_vm0, %v68_v23 }
 0x1c2   :  { %v75_v25 = vpop.xlane.xlu1 %74 }
 0x1c3   :  { %v76_v26 = vadd.f32 %v75_v25, %v72_v24 }
 0x1c5   :  { %77 = vst.msk [vmem:[#allocation4] sm:$0xff] %vm39_vm0, %v76_v26 }
 0x1c6   :  { %v82_v28 = vpop.xlane.xlu1 %81 }
 0x1c7   :  { %v83_v29 = vadd.f32 %v82_v28, %v78_v27 }
 0x1c8   :  { %v89_v30 = vld [vmem:[#allocation3] sm:$0xff] }
 0x1c9   :  { %114 = vlog2.f32 %v89_v30  ;;  %84 = vst.msk [vmem:[#allocation5] sm:$0xff] %vm39_vm0, %v83_v29 }
 0x1cc   :  { %v93_v35 = vld [vmem:[#allocation4] sm:$0xff] }
 0x1d0   :  { %v95_v36 = vld [vmem:[#allocation5] sm:$0xff] }
 0x1d6   :  { %v115_v31 = vpop.eup %114 }
 0x1d7   :  { %v91_v32 = vmul.f32 0.6931472, %v115_v31 }
 0x1d9   :  { %v92_v34 = vadd.f32 %v91_v32, %v88_v33 }
 0x1db   :  { %v94_v37 = vmul.f32 %v93_v35, %v92_v34 }
 0x1dd   :  { %v96_v38 = vsub.f32 %v94_v37, %v95_v36 }
 0x1df   :  { %97 = vst.msk [vmem:[%s204_s2] sm:$0xff] %vm39_vm0, %v96_v38 }
 0x1e0   :  { %102 = vsyncpa [#allocation7], 1 }
 0x1e1   :  { %103 = vsyncpa [#allocation9], 1 }

</bundles_post_ra>
